<compile_context>
chip_gen: v7x
topology: tpu7x:2x2x1
jax: 0.10.0
libtpu: 0.0.40
codegen_flags: <defaults>
</compile_context>

<pallas_src>
import functools
import math

import jax
import jax.numpy as jnp
from jax.experimental import pallas as pl
from jax.experimental.pallas import tpu as pltpu


_EPS_SQ = 1e-24  # (F.normalize eps=1e-12)**2, applied to the squared norm


def _round_up(a, b):
    return (a + b - 1) // b * b


def _normalize_rows_f32(v):
    # torch.nn.functional.normalize(p=2, dim=1, eps=1e-12) in f32:
    #   v / max(||v||, eps)  ==  v * rsqrt(max(||v||^2, eps^2))
    ssq = jnp.sum(v * v, axis=1, keepdims=True)
    return v * jax.lax.rsqrt(jnp.maximum(ssq, _EPS_SQ))


def _matmul_f32(x_ref, w_ref):
    # (TB, F) bf16 x (TC, F) bf16, contracting the last axes -> (TB, TC) f32.
    return jax.lax.dot_general(
        x_ref[...], w_ref[...], (((1,), (1,)), ((), ())),
        preferred_element_type=jnp.float32)


def _cosface_logits_kernel(x_ref, w_ref, out_ref):
    out_ref[...] = _matmul_f32(x_ref, w_ref).astype(out_ref.dtype)


def _cosface_label_kernel(s, m, x_ref, w_ref, label_ref, out_ref):
    logits = _matmul_f32(x_ref, w_ref)                        # (TB, TC) f32
    tb, tc = logits.shape
    col_ids = jax.lax.broadcasted_iota(jnp.int32, (tb, tc), 1)
    # (TB,1) adjustment of the label instead of adding j*TC to the full iota.
    tgt = label_ref[...] - pl.program_id(1) * tc
    out = jnp.where(col_ids == tgt, logits - m, logits)       # CosFace margin
    out_ref[...] = (out * s).astype(out_ref.dtype)


def cosface_product(x, W, label=None, *, s=30.0, m=0.35,
                    tb_max=512, tc_target=2048, out_dtype=jnp.float32):
    """Pallas implementation of CosFaceProduct.forward."""
    B, F = x.shape
    C, Fw = W.shape
    assert F == Fw, "feature dims must match"

    # --- hoisted normalization + bf16 streaming (one fused XLA pass each) ---
    xn = _normalize_rows_f32(x.astype(jnp.float32)).astype(jnp.bfloat16)
    wn = _normalize_rows_f32(W.astype(jnp.float32)).astype(jnp.bfloat16)

    # --- tile sizes -----------------------------------------------------------
    # Rows: cover the whole batch in one tile when possible (each W tile is then
    # read from HBM exactly once). bf16 packs 16 rows per sublane tile, so round
    # to 16 whenever the block is not the exact array extent.
    TB = B if B == _round_up(B, 8) else _round_up(B, 16)
    TB = min(TB, _round_up(tb_max, 16))

    Cr = _round_up(C, 128)
    TC = min(_round_up(tc_target, 128), Cr)

    grid_b = pl.cdiv(B, TB)
    # Keep >=2 class tiles when the batch grid is degenerate so v7x's two
    # TensorCores both get work (no-op on single-core v5e/v6e).
    if grid_b == 1 and Cr > 128:
        TC = min(TC, _round_up(pl.cdiv(C, 2), 128))

    # Keep double-buffered VMEM use under ~40 MiB (fits v7x's 64 MiB physical).
    def _vmem_bytes(tb_, tc_):
        return 2 * (tb_ * F * 2 + tc_ * F * 2 + tb_ * tc_ * 4)

    budget = 40 * 1024 * 1024
    while TC > 128 and _vmem_bytes(TB, TC) > budget:
        TC = _round_up(TC // 2, 128)
    while TB > 16 and _vmem_bytes(TB, TC) > budget:
        TB = _round_up(TB // 2, 16)

    grid = (pl.cdiv(B, TB), pl.cdiv(C, TC))
    out_shape = jax.ShapeDtypeStruct((B, C), out_dtype)  # unpadded; ragged edges
    cparams = pltpu.CompilerParams(
        dimension_semantics=("parallel", "parallel"),
        vmem_limit_bytes=48 * 1024 * 1024)

    x_spec = pl.BlockSpec((TB, F), lambda i, j: (i, 0))
    w_spec = pl.BlockSpec((TC, F), lambda i, j: (j, 0))
    o_spec = pl.BlockSpec((TB, TC), lambda i, j: (i, j))

    if label is None:
        return pl.pallas_call(
            _cosface_logits_kernel,
            out_shape=out_shape,
            grid=grid,
            in_specs=[x_spec, w_spec],
            out_specs=o_spec,
            compiler_params=cparams,
        )(xn, wn)

    lab2d = label.reshape(-1).astype(jnp.int32).reshape(B, 1)
    return pl.pallas_call(
        functools.partial(_cosface_label_kernel, float(s), float(m)),
        out_shape=out_shape,
        grid=grid,
        in_specs=[x_spec, w_spec, pl.BlockSpec((TB, 1), lambda i, j: (i, 0))],
        out_specs=o_spec,
        compiler_params=cparams,
    )(xn, wn, lab2d)


def _xavier_uniform(key, num_classes, num_features):
    # torch.nn.init.xavier_uniform_ on (num_classes, num_features)
    bound = math.sqrt(6.0 / (num_features + num_classes))
    return jax.random.uniform(
        key, (num_classes, num_features), jnp.float32, -bound, bound)


def _reference(x, W, label, s, m, matmul_dtype=jnp.float32):
    xn = _normalize_rows_f32(x.astype(jnp.float32))
    wn = _normalize_rows_f32(W.astype(jnp.float32))
    logits = jax.lax.dot_general(
        xn.astype(matmul_dtype), wn.astype(matmul_dtype),
        (((1,), (1,)), ((), ())), preferred_element_type=jnp.float32)
    if label is None:
        return logits
    one_hot = jax.nn.one_hot(label, W.shape[0], dtype=jnp.float32)
    return (logits * (1.0 - one_hot) + (logits - m) * one_hot) * s


if __name__ == "__main__":
    B, num_features, num_classes = 8, 32, 16
    s_scale, m_margin = 30.0, 0.35

    key = jax.random.PRNGKey(0)
    kx, kw, kl = jax.random.split(key, 3)
    x = jax.random.normal(kx, (B, num_features), jnp.float32)
    W = _xavier_uniform(kw, num_classes, num_features)
    label = jax.random.randint(kl, (B,), 0, num_classes, jnp.int32)

    # labeled path (margin applied) and label=None path (plain cosine logits)
    out = jax.block_until_ready(
        cosface_product(x, W, label, s=s_scale, m=m_margin))
    logits = jax.block_until_ready(
        cosface_product(x, W, None, s=s_scale, m=m_margin))

    assert out.shape == (B, num_classes)
    assert logits.shape == (B, num_classes)

    # tight check vs. a reference that uses the same bf16 MXU matmul
    ref_out_bf16 = _reference(x, W, label, s_scale, m_margin, jnp.bfloat16)
    ref_logits_bf16 = _reference(x, W, None, s_scale, m_margin, jnp.bfloat16)
    assert jnp.allclose(out, ref_out_bf16, atol=2e-3, rtol=2e-3)
    assert jnp.allclose(logits, ref_logits_bf16, atol=2e-3, rtol=2e-3)

    # semantic sanity check vs. full-f32 reference (loose: bf16 matmul inputs)
    ref_out_f32 = _reference(x, W, label, s_scale, m_margin, jnp.float32)
    assert jnp.allclose(out, ref_out_f32, atol=0.2, rtol=0.0)

    # exercise the ragged / multi-class-tile path (B, C not tile-aligned)
    B2, C2, F2 = 13, 200, 32
    k2x, k2w, k2l = jax.random.split(jax.random.PRNGKey(1), 3)
    x2 = jax.random.normal(k2x, (B2, F2), jnp.float32)
    W2 = _xavier_uniform(k2w, C2, F2)
    label2 = jax.random.randint(k2l, (B2,), 0, C2, jnp.int32)
    out2 = jax.block_until_ready(
        cosface_product(x2, W2, label2, s=s_scale, m=m_margin))
    ref2 = _reference(x2, W2, label2, s_scale, m_margin, jnp.bfloat16)
    assert out2.shape == (B2, C2)
    assert jnp.allclose(out2, ref2, atol=2e-3, rtol=2e-3)

    print("KERNEL_OK")
</pallas_src>

<mosaic_0001>
module attributes {stable_mosaic.version = 11 : i64} {
  func.func @_cosface_label_kernel(%arg0: i32, %arg1: i32, %arg2: memref<8x32xbf16, #tpu.memory_space<vmem>>, %arg3: memref<128x32xbf16, #tpu.memory_space<vmem>>, %arg4: memref<8x1xi32, #tpu.memory_space<vmem>>, %arg5: memref<8x128xf32, #tpu.memory_space<vmem>>) attributes {dimension_semantics = [#tpu.dimension_semantics<parallel>, #tpu.dimension_semantics<parallel>], iteration_bounds = array<i64: 1, 1>, scalar_prefetch = 0 : i64, scratch_operands = 0 : i64, tpu.core_type = #tpu.core_type<tc>, window_params = [{transform_indices = @transform_0, window_bounds = array<i64: 8, 32>}, {transform_indices = @transform_1, window_bounds = array<i64: 128, 32>}, {transform_indices = @transform_2, window_bounds = array<i64: 8, 1>}, {transform_indices = @transform_3, window_bounds = array<i64: 8, 128>}]} {
    %c0 = arith.constant 0 : index
    %c0_0 = arith.constant 0 : index
    %0 = vector.load %arg2[%c0, %c0_0] : memref<8x32xbf16, #tpu.memory_space<vmem>>, vector<8x32xbf16>
    %c0_1 = arith.constant 0 : index
    %c0_2 = arith.constant 0 : index
    %1 = vector.load %arg3[%c0_1, %c0_2] : memref<128x32xbf16, #tpu.memory_space<vmem>>, vector<128x32xbf16>
    %cst = arith.constant dense<0.000000e+00> : vector<8x128xf32>
    %2 = tpu.matmul %0, %1, %cst {dimension_numbers = #tpu.dot_dimension_numbers<[1], [1], [0], [0], [0, 0, 1, 0], [], []>} : vector<8x32xbf16>, vector<128x32xbf16>, vector<8x128xf32> -> vector<8x128xf32>
    %3 = tpu.iota {dimensions = array<i32: 1>} : vector<8x128xi32>
    %c0_3 = arith.constant 0 : index
    %c0_4 = arith.constant 0 : index
    %4 = vector.load %arg4[%c0_3, %c0_4] : memref<8x1xi32, #tpu.memory_space<vmem>>, vector<8x1xi32>
    %c128_i32 = arith.constant 128 : i32
    %5 = arith.muli %arg1, %c128_i32 : i32
    %6 = vector.broadcast %5 : i32 to vector<8x1xi32>
    %7 = arith.subi %4, %6 : vector<8x1xi32>
    %8 = vector.broadcast %7 : vector<8x1xi32> to vector<8x128xi32>
    %9 = arith.cmpi eq, %3, %8 : vector<8x128xi32>
    %cst_5 = arith.constant 3.500000e-01 : f32
    %10 = vector.broadcast %cst_5 : f32 to vector<8x128xf32>
    %11 = arith.subf %2, %10 : vector<8x128xf32>
    %12 = arith.select %9, %11, %2 : vector<8x128xi1>, vector<8x128xf32>
    %cst_6 = arith.constant 3.000000e+01 : f32
    %13 = vector.broadcast %cst_6 : f32 to vector<8x128xf32>
    %14 = arith.mulf %12, %13 : vector<8x128xf32>
    %c0_7 = arith.constant 0 : index
    %c0_8 = arith.constant 0 : index
    %15 = vector.load %arg5[%c0_7, %c0_8] : memref<8x128xf32, #tpu.memory_space<vmem>>, vector<8x128xf32>
    tpu.vector_store %arg5[%c0_7, %c0_8], %14 {strides = array<i32>} : memref<8x128xf32, #tpu.memory_space<vmem>>, vector<8x128xf32>,
    return
  }
  func.func @transform_0(%arg0: i32, %arg1: i32) -> (i32, i32) {
    %c0_i32 = arith.constant 0 : i32
    %c0_i32_0 = arith.constant 0 : i32
    return %arg0, %c0_i32 : i32, i32
  }
  func.func @transform_1(%arg0: i32, %arg1: i32) -> (i32, i32) {
    %c0_i32 = arith.constant 0 : i32
    %c0_i32_0 = arith.constant 0 : i32
    return %arg1, %c0_i32 : i32, i32
  }
  func.func @transform_2(%arg0: i32, %arg1: i32) -> (i32, i32) {
    %c0_i32 = arith.constant 0 : i32
    %c0_i32_0 = arith.constant 0 : i32
    return %arg0, %c0_i32 : i32, i32
  }
  func.func @transform_3(%arg0: i32, %arg1: i32) -> (i32, i32) {
    %c0_i32 = arith.constant 0 : i32
    return %arg0, %arg1 : i32, i32
  }
}

</mosaic_0001>

<bundles_post_ra>
// kernel: tpu_custom_call.1
= control target key start
LH: loop header
LB: loop body
LE: loop exit
PB: predicated region body
PF: predicated region fallthrough
CT: control target
= control target key end

     0   :  { %v245_v1 = vmov 0.0   ;;  %vm73_vm0 = vcmask 261120   ;;  %vm246_vm1 = vmmov 0   ;;  %v247_v6 = vmov 0   ;;  %s320_s0 = inlined_call_operand.vmem [shape: bf16[8,32], index: 0, kind: input, shape index: {}]   ;;  %s321_s1 = inlined_call_operand.vmem [shape: bf16[16,32], index: 1, kind: input, shape index: {}]   ;;  %s322_s2 = inlined_call_operand.vmem [shape: s32[8,1], index: 2, kind: input, shape index: {}]   ;;  %s323_s3 = inlined_call_operand.hbm [shape: f32[8,16], index: 3, kind: output, shape index: {}]  }
   0x1   :  { %v213_v0 = vld [vmem:[%s321_s1] sm:$0xff]   ;;  %188 = vmatprep.subr.bf16.mxu0 %v245_v1  ;;  %v214_v3 = vld [vmem:[%s321_s1 + $0x8] sm:$0xff]   ;;  %204 = vmatprep.mubr.msk.bf16.mxu0 %vm246_vm1, %v245_v1 }
   0x2   :  { %v78_v2 = vsel %vm73_vm0, %v213_v0, 0  ;;  %v81_v4 = vsel %vm73_vm0, %v214_v3, 0  ;;  %v143_v5 = vld [vmem:[%s322_s2] sm:$0xff]  ;;  %212 = vset.pattern.permute.xlu0 %v247_v6 }
   0x3   :  { %189 = vmatpush3.bf16.xpose.msra.mxu0 %v78_v2 }
   0x4   :  { %190 = vmatprep.subr.bf16.mxu0 %v245_v1 }
   0x5   :  { %8 = vsyncpa [#allocation3], 0  ;;  %148 = vperm.xlu0 %212, %v143_v5   ;;  %v215_v7 = vld [vmem:[%s321_s1 + $0x10] sm:$0xff]   ;;  %v216_v9 = vld [vmem:[%s321_s1 + $0x18] sm:$0xff]   ;;  %v141_v20 = vlaneseq  ;;  %s248_s4 = smov [#allocation2]  }
   0x6   :  { %v84_v8 = vsel %vm73_vm0, %v215_v7, 0  ;;  %v87_v10 = vsel %vm73_vm0, %v216_v9, 0  ;;  %v217_v11 = vld [vmem:[%s321_s1 + $0x20] sm:$0xff]   ;;  %v218_v13 = vld [vmem:[%s321_s1 + $0x28] sm:$0xff]   ;;  %v219_v15 = vld [vmem:[%s321_s1 + $0x30] sm:$0xff]   ;;  %s161_s5 = sshll.u32 %s248_s4, 4  ;;  %s162_s5 = int_to_ptr.vmem [resolvable:$true] %s161_s5 }
   0x7   :  { %v90_v12 = vsel %vm73_vm0, %v217_v11, 0  ;;  %v93_v14 = vsel %vm73_vm0, %v218_v13, 0  ;;  %v96_v16 = vsel %vm73_vm0, %v219_v15, 0  ;;  %v220_v17 = vld [vmem:[%s321_s1 + $0x38] sm:$0xff]   ;;  %v16_v19 = vld [vmem:[%s320_s0] sm:$0xf]  ;;  %p226_p1 = scmp.lt.s32.totalorder %s162_s5, %s162_s5 }
   0x8   :  { %v99_v18 = vsel %vm73_vm0, %v220_v17, 0  ;;  %v142_v21 = vand.u32 127, %v141_v20  ;;  %s221_s1 = scalar_lea.vmem %s162_s5, 128 }
   0x9   :  { %p222_p0 = scmp.ne.s32.totalorder %s162_s5, %s221_s1  ;;  %p227_p2 = scmp.lt.s32.totalorder %s221_s1, %s221_s1 }
   0xb   :  { %191 = vmatpush3.bf16.xpose.msra.mxu0 %v81_v4  ;;  %p228_p3 = por %p227_p2, %p226_p1 }
   0xc   :  { %192 = vmatprep.subr.bf16.mxu0 %v245_v1 }
   0xd   :  { %p229_p4 = pnand %p228_p3, %p222_p0 }
  0x13   :  { %193 = vmatpush3.bf16.xpose.msra.mxu0 %v84_v8 }
  0x14   :  { %194 = vmatprep.subr.bf16.mxu0 %v245_v1 }
  0x1b   :  { %195 = vmatpush3.bf16.xpose.msra.mxu0 %v87_v10 }
  0x1c   :  { %196 = vmatprep.subr.bf16.mxu0 %v245_v1 }
  0x23   :  { %197 = vmatpush3.bf16.xpose.msra.mxu0 %v90_v12 }
  0x24   :  { %198 = vmatprep.subr.bf16.mxu0 %v245_v1 }
  0x2b   :  { %199 = vmatpush3.bf16.xpose.msra.mxu0 %v93_v14 }
  0x2c   :  { %200 = vmatprep.subr.bf16.mxu0 %v245_v1 }
  0x33   :  { %201 = vmatpush3.bf16.xpose.msra.mxu0 %v96_v16 }
  0x34   :  { %202 = vmatprep.subr.bf16.mxu0 %v245_v1 }
  0x3b   :  { %203 = vmatpush3.bf16.xpose.msra.mxu0 %v99_v18 }
  0x42   :  { %205 = vmatmul.mubr.msk.bf16.vlgmr.msra.gmra.mrb[0].mxu0 %vm73_vm0, %v16_v19 }
  0x84   :  { %v149_v22 = vpop.permute.xlu0 %148 }
  0x85   :  { %vm150_vm2 = vcmp.eq.s32.totalorder %v142_v21, %v149_v22 }
 0x115   :  { %v135_v23 = vpop.f32.mrb[0].mxu0 }
 0x116   :  { %v178_v24 = vadd.f32 -0.35, %v135_v23  ;;  %v206_v25 = vpop.f32.mrb[1].mxu0 }
 0x117   :  { %v138_v26 = vpop.f32.mrb[2].mxu0 }
 0x118   :  { %v207_v27 = vpop.f32.mrb[3].mxu0  ;;  %v152_v28 = vsel %vm150_vm2, %v178_v24, %v135_v23 }
 0x119   :  { %v153_v29 = vmul.f32 30.0, %v152_v28 }
 0x11b   :  { %154 = vst [vmem:[#allocation2] sm:$0xff] %v153_v29 }
 0x11c   :  { %232 = shalt.err (!%p229_p4)
}
 0x11d   :  { %s233_s7 = scalar_lea.hbm %s323_s3, 128 }
 0x11e   :  { %p234_p5 = scmp.ne.s32.totalorder %s323_s3, %s233_s7  ;;  %p237_p6 = scmp.lt.u32.totalorder %s233_s7, %s323_s3 }
 0x120   :  { %p239_p7 = pnand %p237_p6, %p234_p5 }
 0x122   :  { %242 = shalt.err (!%p239_p7)
}
 0x123   :  { %164 = dma.vmem_to_hbm [thread:$0]  %s162_s5, 128, %s323_s3, [#allocation3]  }
 0x124   :  { %243 = dma.done.wait [#allocation3], 128  }
 0x125   :  { %244 = vsyncadd [#allocation3], 4294967168 }
 0x126   :  { %168 = vsyncpa [#allocation3], 1 }

</bundles_post_ra>
